<compile_context>
chip_gen: v7x
topology: tpu7x:2x2x1
jax: 0.10.0
libtpu: 0.0.40
codegen_flags: <defaults>
</compile_context>

<pallas_src>
import jax
import jax.numpy as jnp
from jax import lax
from jax.experimental import pallas as pl
from jax.experimental.pallas import tpu as pltpu


def _round_up(x: int, m: int) -> int:
    return ((x + m - 1) // m) * m


# ---------------------------------------------------------------------------
# Kernel 1: row-wise L2 normalization (F.normalize(p=2, dim=1, eps=1e-12)).
# ---------------------------------------------------------------------------
def _normalize_kernel(x_ref, o_ref):
    x = x_ref[...].astype(jnp.float32)                       # (TM, Dp)
    sq = jnp.sum(x * x, axis=1, keepdims=True)               # (TM, 1)
    # 1/max(||x||, 1e-12) == rsqrt(max(||x||^2, 1e-24)); rsqrt runs on the EUP.
    inv = lax.rsqrt(jnp.maximum(sq, 1e-24))
    o_ref[...] = (x * inv).astype(o_ref.dtype)


def _normalize_rows(x_padded, block_rows, out_dtype, vmem_limit):
    np_, d = x_padded.shape
    t = np_ // block_rows
    return pl.pallas_call(
        _normalize_kernel,
        out_shape=jax.ShapeDtypeStruct((np_, d), out_dtype),
        grid_spec=pltpu.PrefetchScalarGridSpec(
            num_scalar_prefetch=0,
            grid=(t,),
            in_specs=[pl.BlockSpec((block_rows, d), lambda i: (i, 0))],
            out_specs=pl.BlockSpec((block_rows, d), lambda i: (i, 0)),
        ),
        compiler_params=pltpu.CompilerParams(
            dimension_semantics=("parallel",),
            vmem_limit_bytes=vmem_limit),
    )(x_padded)


# ---------------------------------------------------------------------------
# Kernel 2: tiled symmetric cosine-similarity loss partial sums.
# ---------------------------------------------------------------------------
def _make_ecs_tile_kernel(ecs_threshold: float, t_blocks: int):
    two_t = float(2.0 * ecs_threshold)        # Python float -> traced literal
    half = t_blocks // 2
    even = (t_blocks % 2 == 0) and (t_blocks > 1)

    def kernel(a_ref, b_ref, out_ref):
        jj = pl.program_id(1)

        # (TM, Dp) x (TN, Dp), contracting the last dim of both operands; the
        # MXU operand path handles the rhs "transpose" (no XLU transpose).
        c = lax.dot_general(
            a_ref[...], b_ref[...],
            dimension_numbers=(((1,), (1,)), ((), ())),
            preferred_element_type=jnp.float32)              # (TM, TN) f32

        @pl.when(jj == 0)
        def _diag_block():
            # Diagonal block: zero the diagonal entries before relu, then
            # initialize the resident accumulator by assignment (no zero-init
            # pass needed).
            rows = lax.broadcasted_iota(jnp.int32, c.shape, 0)
            cols = lax.broadcasted_iota(jnp.int32, c.shape, 1)
            r = jnp.maximum(jnp.where(rows == cols, 0.0, c), 0.0)
            s = jnp.sum(r * (two_t - r), axis=0, keepdims=True)   # (1, TN)
            out_ref[...] = s.reshape(out_ref.shape)

        @pl.when(jj > 0)
        def _offdiag_block():
            r = jnp.maximum(c, 0.0)
            s = jnp.sum(r * (two_t - r), axis=0, keepdims=True)   # (1, TN)
            if even:
                # When T is even, the jj == T//2 column visits each unordered
                # block pair from both ends -> weight 1; all others weight 2.
                w = jnp.where(jj == half, 1.0, 2.0)
            else:
                w = 2.0
            out_ref[...] += (w * s).reshape(out_ref.shape)

    return kernel


# ---------------------------------------------------------------------------
# Wrapper: ECSLatentLayer.forward
# ---------------------------------------------------------------------------
def ecs_latent_layer(x_dict, *, ecs_threshold: float = 0.6, training: bool = True,
                     block_rows: int = 512, compute_dtype=None):
    """JAX/Pallas equivalent of ECSLatentLayer.forward."""
    cell_emb = x_dict['h']
    if not (training and ('ecs' in x_dict)):
        return cell_emb, 0

    n, d = cell_emb.shape

    # MXU input dtype: bf16 whenever the matmul is large enough that the
    # quantization noise is irrelevant to the scalar loss; f32 otherwise.
    # Accumulation / epilogue are always f32.
    if compute_dtype is None:
        compute_dtype = jnp.bfloat16 if (d >= 256 or n >= 4096) else jnp.float32

    # --- tile selection -------------------------------------------------
    n8 = _round_up(n, 8)
    if n8 <= block_rows:
        tm = n8                                      # single row block
    else:
        target = min(block_rows, -(-n // 2))         # >= 2 row blocks (megacore)
        align = 128 if target >= 128 else 8
        tm = _round_up(target, align)
    np_ = _round_up(n, tm)                           # padded row count
    t = np_ // tm                                    # number of row blocks
    tj = t // 2 + 1                                  # symmetric half-sweep columns

    d_pad = _round_up(d, 128)                        # lane-dense K

    x = cell_emb
    if (np_ != n) or (d_pad != d):
        x = jnp.pad(x, ((0, np_ - n), (0, d_pad - d)))   # zeros contribute exactly 0

    # --- VMEM budget: inputs (double-buffered) + (tm,tm) f32 c + temps ---
    itemsize = jnp.dtype(compute_dtype).itemsize
    vmem_need = (4 * tm * d_pad * itemsize           # 2 inputs x double buffer
                 + 3 * tm * tm * 4                   # c + epilogue temporaries
                 + (2 << 20))                        # slack
    vmem_limit = int(min(max(vmem_need, 32 << 20), 48 << 20))  # v7x-safe cap

    x_normed = _normalize_rows(x, tm, compute_dtype, vmem_limit)

    def a_map(i, jj):
        return (i, 0)

    def b_map(i, jj):
        bj = i + jj
        bj = jnp.where(bj >= t, bj - t, bj)          # (i + jj) mod T, no rem needed
        return (bj, 0)

    def o_map(i, jj):
        return (i, 0, 0)

    partial = pl.pallas_call(
        _make_ecs_tile_kernel(ecs_threshold, t),
        out_shape=jax.ShapeDtypeStruct((t, 1, tm), jnp.float32),
        grid_spec=pltpu.PrefetchScalarGridSpec(
            num_scalar_prefetch=0,
            grid=(t, tj),
            in_specs=[pl.BlockSpec((tm, d_pad), a_map),
                      pl.BlockSpec((tm, d_pad), b_map)],
            out_specs=pl.BlockSpec((1, 1, tm), o_map),
        ),
        compiler_params=pltpu.CompilerParams(
            dimension_semantics=("parallel", "arbitrary"),
            vmem_limit_bytes=vmem_limit),
    )(x_normed, x_normed)

    # Tiny final reduction of the lane-dense partial sums happens in JAX.
    off_diag_sum = jnp.sum(partial)
    n2 = float(n * n)
    loss = (n2 * (1.0 - ecs_threshold ** 2) + off_diag_sum) / n2
    return cell_emb, loss


# ---------------------------------------------------------------------------
# Pure-JAX reference (mirrors the PyTorch module) for correctness checking.
# ---------------------------------------------------------------------------
def ecs_reference(cell_emb, ecs_threshold=0.6):
    x = cell_emb.astype(jnp.float32)
    norm = jnp.sqrt(jnp.sum(x * x, axis=1, keepdims=True))
    x_normed = x / jnp.maximum(norm, 1e-12)
    cos_sim = x_normed @ x_normed.T
    n = cos_sim.shape[0]
    cos_sim = jnp.where(jnp.eye(n, dtype=bool), 0.0, cos_sim)
    cos_sim = jnp.maximum(cos_sim, 0.0)
    return jnp.mean(1.0 - (cos_sim - ecs_threshold) ** 2)


if __name__ == "__main__":
    key = jax.random.PRNGKey(0)

    # Case 1: tiny shape, single block (N=8, D=32), f32 path.
    n1, d1 = 8, 32
    emb1 = jax.random.normal(key, (n1, d1), dtype=jnp.float32)
    out1, loss1 = ecs_latent_layer({'h': emb1, 'ecs': 1.0}, ecs_threshold=0.6,
                                   training=True)
    out1 = jax.block_until_ready(out1)
    loss1 = jax.block_until_ready(loss1)
    ref1 = ecs_reference(emb1, 0.6)
    assert out1.shape == (n1, d1)
    assert jnp.allclose(out1, emb1)
    assert jnp.allclose(loss1, ref1, atol=1e-3, rtol=1e-3), (loss1, ref1)

    # Case 2: multi-block, even T, non-aligned N -> exercises tiling, symmetry
    # weights, the diagonal-block mask, and zero-row/column padding.
    n2, d2 = 200, 48
    emb2 = jax.random.normal(jax.random.PRNGKey(1), (n2, d2), dtype=jnp.float32)
    out2, loss2 = ecs_latent_layer({'h': emb2, 'ecs': 1.0}, ecs_threshold=0.6,
                                   training=True, block_rows=64)
    loss2 = jax.block_until_ready(loss2)
    ref2 = ecs_reference(emb2, 0.6)
    assert jnp.allclose(loss2, ref2, atol=1e-3, rtol=1e-3), (loss2, ref2)

    # Case 2b: odd number of row blocks (T=3) -> odd-T symmetry weighting.
    n2b, d2b = 150, 40
    emb2b = jax.random.normal(jax.random.PRNGKey(2), (n2b, d2b), dtype=jnp.float32)
    _, loss2b = ecs_latent_layer({'h': emb2b, 'ecs': 1.0}, ecs_threshold=0.6,
                                 training=True, block_rows=64)
    loss2b = jax.block_until_ready(loss2b)
    ref2b = ecs_reference(emb2b, 0.6)
    assert jnp.allclose(loss2b, ref2b, atol=1e-3, rtol=1e-3), (loss2b, ref2b)

    # Case 3: bf16 MXU-input path (D >= 256), f32 accumulation/epilogue.
    n3, d3 = 96, 256
    emb3 = jax.random.normal(jax.random.PRNGKey(3), (n3, d3), dtype=jnp.float32)
    _, loss3 = ecs_latent_layer({'h': emb3, 'ecs': 1.0}, ecs_threshold=0.6,
                                training=True)
    loss3 = jax.block_until_ready(loss3)
    ref3 = ecs_reference(emb3, 0.6)
    assert jnp.allclose(loss3, ref3, atol=5e-3, rtol=5e-3), (loss3, ref3)

    # Case 4: eval / no-'ecs' path returns (h, 0).
    out4, zero = ecs_latent_layer({'h': emb1}, training=True)
    assert zero == 0

    print("KERNEL_OK")
</pallas_src>

<mosaic_0001>
module attributes {stable_mosaic.version = 11 : i64} {
  func.func @_normalize_kernel(%arg0: i32, %arg1: memref<8x128xf32, #tpu.memory_space<vmem>>, %arg2: memref<8x128xf32, #tpu.memory_space<vmem>>) attributes {dimension_semantics = [#tpu.dimension_semantics<parallel>], iteration_bounds = array<i64: 1>, scalar_prefetch = 0 : i64, scratch_operands = 0 : i64, tpu.core_type = #tpu.core_type<tc>, window_params = [{transform_indices = @transform_0, window_bounds = array<i64: 8, 128>}, {transform_indices = @transform_1, window_bounds = array<i64: 8, 128>}]} {
    %c0 = arith.constant 0 : index
    %c0_0 = arith.constant 0 : index
    %0 = vector.load %arg1[%c0, %c0_0] : memref<8x128xf32, #tpu.memory_space<vmem>>, vector<8x128xf32>
    %1 = arith.mulf %0, %0 : vector<8x128xf32>
    %cst = arith.constant dense<0.000000e+00> : vector<8xf32>
    %2 = vector.multi_reduction <add>, %1, %cst [1] : vector<8x128xf32> to vector<8xf32>
    %3 = vector.shape_cast %2 : vector<8xf32> to vector<8x1xf32>
    %cst_1 = arith.constant 1.000000e-24 : f32
    %4 = vector.broadcast %cst_1 : f32 to vector<8x1xf32>
    %5 = arith.maximumf %3, %4 : vector<8x1xf32>
    %6 = math.rsqrt %5 : vector<8x1xf32>
    %7 = vector.broadcast %6 : vector<8x1xf32> to vector<8x128xf32>
    %8 = arith.mulf %0, %7 : vector<8x128xf32>
    %c0_2 = arith.constant 0 : index
    %c0_3 = arith.constant 0 : index
    %9 = vector.load %arg2[%c0_2, %c0_3] : memref<8x128xf32, #tpu.memory_space<vmem>>, vector<8x128xf32>
    tpu.vector_store %arg2[%c0_2, %c0_3], %8 {strides = array<i32>} : memref<8x128xf32, #tpu.memory_space<vmem>>, vector<8x128xf32>,
    return
  }
  func.func @transform_0(%arg0: i32) -> (i32, i32) {
    %c0_i32 = arith.constant 0 : i32
    %c0_i32_0 = arith.constant 0 : i32
    return %arg0, %c0_i32 : i32, i32
  }
  func.func @transform_1(%arg0: i32) -> (i32, i32) {
    %c0_i32 = arith.constant 0 : i32
    %c0_i32_0 = arith.constant 0 : i32
    return %arg0, %c0_i32 : i32, i32
  }
}

</mosaic_0001>

<bundles_post_ra>
// kernel: tpu_custom_call.1
= control target key start
LH: loop header
LB: loop body
LE: loop exit
PB: predicated region body
PF: predicated region fallthrough
CT: control target
= control target key end

     0   :  { %6 = vsyncpa [#allocation3], 0  ;;  %s132_s0 = inlined_call_operand.hbm [shape: f32[8,128], index: 0, kind: input, shape index: {}]   ;;  %s133_s1 = inlined_call_operand.hbm [shape: f32[8,128], index: 1, kind: output, shape index: {}]  }
   0x1   :  { %7 = vsyncpa [#allocation4], 0  ;;  %s96_s6 = smov [#allocation2]   ;;  %s48_s10 = scalar_lea.hbm %s132_s0, 128 }
   0x2   :  { %s14_s7 = sshll.u32 %s96_s6, 4  ;;  %p49_p0 = scmp.ne.s32.totalorder %s132_s0, %s48_s10  ;;  %s15_s7 = int_to_ptr.vmem [resolvable:$true] %s14_s7 }
   0x3   :  { %p52_p1 = scmp.lt.u32.totalorder %s48_s10, %s132_s0 }
   0x5   :  { %p54_p2 = pnand %p52_p1, %p49_p0 }
   0x7   :  { %57 = shalt.err (!%p54_p2)
}
   0x8   :  { %s58_s15 = scalar_lea.vmem %s15_s7, 128  ;;  %p63_p4 = scmp.lt.s32.totalorder %s15_s7, %s15_s7 }
   0x9   :  { %p59_p3 = scmp.ne.s32.totalorder %s15_s7, %s58_s15  ;;  %p64_p5 = scmp.lt.s32.totalorder %s58_s15, %s58_s15 }
   0xb   :  { %p65_p6 = por %p64_p5, %p63_p4 }
   0xd   :  { %p66_p7 = pnand %p65_p6, %p59_p3 }
   0xf   :  { %69 = shalt.err (!%p66_p7)
}
  0x10   :  { %17 = dma.hbm_to_vmem [thread:$0]  %s132_s0, 128, %s15_s7, [#allocation3]  }
  0x11   :  { %92 = dma.done.wait [#allocation3], 128  }
  0x12   :  { %93 = vsyncadd [#allocation3], 4294967168  ;;  %v21_v0 = vld [vmem:[#allocation2] sm:$0xff]  ;;  %s97_s18 = smov [#allocation5]  }
  0x13   :  { %v22_v1 = vmul.f32 %v21_v0, %v21_v0  ;;  %s35_s19 = sshll.u32 %s97_s18, 4  ;;  %s36_s19 = int_to_ptr.vmem [resolvable:$true] %s35_s19 }
  0x14   :  { %s70_s20 = scalar_lea.vmem %s36_s19, 128  ;;  %p75_p9 = scmp.lt.s32.totalorder %s36_s19, %s36_s19 }
  0x15   :  { %23 = vadd.xlane.f32.xlu0 %v22_v1  ;;  %p71_p8 = scmp.ne.s32.totalorder %s36_s19, %s70_s20  ;;  %p76_p10 = scmp.lt.s32.totalorder %s70_s20, %s70_s20 }
  0x17   :  { %p77_p11 = por %p76_p10, %p75_p9 }
  0x19   :  { %p78_p12 = pnand %p77_p11, %p71_p8 }
  0xa2   :  { %v24_v2 = vpop.xlane.xlu0 %23 }
  0xa3   :  { %v25_v3 = vmax.f32 %v24_v2, 1e-24 }
  0xa5   :  { %46 = vrsqrt.f32 %v25_v3 }
  0xaf   :  { %v47_v4 = vpop.eup %46 }
  0xb0   :  { %v27_v5 = vmul.f32 %v47_v4, %v21_v0 }
  0xb2   :  { %28 = vst [vmem:[#allocation5] sm:$0xff] %v27_v5 }
  0xb3   :  { %81 = shalt.err (!%p78_p12)
}
  0xb4   :  { %s82_s22 = scalar_lea.hbm %s133_s1, 128 }
  0xb5   :  { %p83_p13 = scmp.ne.s32.totalorder %s133_s1, %s82_s22  ;;  %p86_p0 = scmp.lt.u32.totalorder %s82_s22, %s133_s1 }
  0xb7   :  { %p88_p1 = pnand %p86_p0, %p83_p13 }
  0xb9   :  { %91 = shalt.err (!%p88_p1)
}
  0xba   :  { %38 = dma.vmem_to_hbm [thread:$0]  %s36_s19, 128, %s133_s1, [#allocation4]  }
  0xbb   :  { %94 = dma.done.wait [#allocation4], 128  }
  0xbc   :  { %95 = vsyncadd [#allocation4], 4294967168 }
  0xbd   :  { %42 = vsyncpa [#allocation3], 1 }
  0xbe   :  { %43 = vsyncpa [#allocation4], 1 }

</bundles_post_ra>
